<compile_context>
chip_gen: v7x
topology: tpu7x:2x2x1
jax: 0.10.0
libtpu: 0.0.40
codegen_flags: <defaults>
</compile_context>

<pallas_src>
import jax
import jax.numpy as jnp
from jax.experimental import pallas as pl
from jax.experimental.pallas import tpu as pltpu


def _round_up(v, m):
    return (v + m - 1) // m * m


def _gconv_kernel(a_ref, x_ref, w_ref, b_ref, o_ref):
    # a: (Bt, Np, Np)   x: (Bt, Np, Fip)   w: (Fip, Fop) bf16   b: (1, Fop) f32
    # o: (Bt, Np, Fop)
    # ---- row softmax over the (padded) key dim; all softmax math in f32 ----
    # Padded key columns hold -1e9 so exp() gives them ~0 weight (masked_fill trick).
    a = a_ref[...].astype(jnp.float32)
    a_max = jnp.max(a, axis=-1, keepdims=True)
    e = jnp.exp(a - a_max)
    a_sm = e * pl.reciprocal(jnp.sum(e, axis=-1, keepdims=True), approx=True)
    a_bf = a_sm.astype(jnp.bfloat16)            # bf16 MXU operand

    # ---- Linear + ReLU: fold batch into sublanes -> one tall bf16 MXU matmul ----
    x = x_ref[...]
    bt, n_pad, f_in = x.shape
    f_out = w_ref.shape[1]
    x2d = x.reshape(bt * n_pad, f_in).astype(jnp.bfloat16)
    ux2d = jnp.maximum(
        jnp.dot(x2d, w_ref[...], preferred_element_type=jnp.float32) + b_ref[...],
        0.0)
    ux = ux2d.reshape(bt, n_pad, f_out).astype(jnp.bfloat16)

    # ---- residual: x + softmax(A) @ relu(xW + b); bf16 operands, f32 accumulate ----
    out = x.astype(jnp.float32) + jnp.einsum(
        "bij,bjf->bif", a_bf, ux, preferred_element_type=jnp.float32)
    o_ref[...] = out.astype(o_ref.dtype)


def _vmem_budgets():
    """(per-step block budget, vmem_limit_bytes, target grid steps) per TPU gen."""
    try:
        vmem_cap = pltpu.get_tpu_info().vmem_capacity_bytes
    except Exception:
        vmem_cap = 128 * 1024 * 1024
    if vmem_cap <= 64 * 1024 * 1024:
        # v7x: 64 MiB VMEM, 2 TensorCores -> smaller blocks, >= 4 steps per core.
        return 5 * 1024 * 1024, 32 * 1024 * 1024, 8
    # v5e / v6e: 128 MiB VMEM, single TensorCore -> bigger blocks, 2-3 steps.
    return 12 * 1024 * 1024, 64 * 1024 * 1024, 3


def _choose_batch_tile(total_b, per_b_bytes, block_budget, target_steps):
    bt = max(1, min(total_b, block_budget // max(per_b_bytes, 1)))
    eff_steps = max(1, min(target_steps, total_b))
    bt = min(bt, max(1, total_b // eff_steps))
    # Prefer a divisor of total_b so no fully-padded batch tile is ever
    # DMA'd, softmaxed or matmul'd (bt=1 always divides, so this terminates).
    while total_b % bt:
        bt -= 1
    return bt


def gconv_pallas(A, x, w_eff, bias):
    """Batched Gconv forward (norm=True, x_mask=None).

    A: (B, N, N), x: (B, N, Fin), w_eff: (Fout, Fin) weight-normed Linear
    weight, bias: (Fout,). Returns (B, N, Fout).
    """
    B, N, Fin = x.shape
    Fout = w_eff.shape[0]
    if Fin != Fout:
        raise ValueError("residual x + A@ux requires in_features == out_features")

    # Lane-dense key dim for moderate N (unmasked loads, full-lane reductions,
    # full MXU K); keep 8-alignment for tiny N where a 16x pad isn't worth it.
    n_align = 128 if N >= 64 else 8
    n_pad = _round_up(N, n_align)
    fi_pad = _round_up(Fin, 128)
    fo_pad = _round_up(Fout, 128)

    if n_pad != N:
        # padded key columns -> -1e9 so the softmax assigns them ~0 weight
        A = jnp.pad(A, ((0, 0), (0, n_pad - N), (0, n_pad - N)),
                    constant_values=-1e9)
    if n_pad != N or fi_pad != Fin:
        x = jnp.pad(x, ((0, 0), (0, n_pad - N), (0, fi_pad - Fin)))

    # Pre-transposed, zero-padded, bf16 weight (Fin_pad, Fout_pad): MXU-native.
    w_t = jnp.pad(jnp.asarray(w_eff, jnp.float32).T,
                  ((0, fi_pad - Fin), (0, fo_pad - Fout))).astype(jnp.bfloat16)
    b2d = jnp.pad(jnp.asarray(bias, jnp.float32).reshape(1, Fout),
                  ((0, 0), (0, fo_pad - Fout)))

    block_budget, vmem_limit, target_steps = _vmem_budgets()

    out_isz = jnp.dtype(x.dtype).itemsize
    # Per-batch-element VMEM: DMA'd blocks + live in-kernel temporaries.
    per_b = (n_pad * n_pad * A.dtype.itemsize               # A block
             + n_pad * fi_pad * x.dtype.itemsize            # x block
             + n_pad * fo_pad * out_isz                     # out block
             + 3 * n_pad * n_pad * 4 + n_pad * n_pad * 2    # a/e/a_sm f32 + bf16
             + n_pad * fi_pad * 2                           # bf16 x copy for MXU
             + n_pad * fo_pad * (4 + 2 + 4))                # ux f32, ux bf16, f32 acc
    bt = _choose_batch_tile(B, per_b, block_budget, target_steps)
    b_pad = pl.cdiv(B, bt) * bt
    if b_pad != B:
        A = jnp.pad(A, ((0, b_pad - B), (0, 0), (0, 0)))
        x = jnp.pad(x, ((0, b_pad - B), (0, 0), (0, 0)))

    out = pl.pallas_call(
        _gconv_kernel,
        out_shape=jax.ShapeDtypeStruct((b_pad, n_pad, fo_pad), x.dtype),
        grid_spec=pltpu.PrefetchScalarGridSpec(
            num_scalar_prefetch=0,
            grid=(b_pad // bt,),
            in_specs=[
                pl.BlockSpec((bt, n_pad, n_pad), lambda b: (b, 0, 0)),
                pl.BlockSpec((bt, n_pad, fi_pad), lambda b: (b, 0, 0)),
                # constant block index -> weight/bias stay resident in VMEM
                pl.BlockSpec((fi_pad, fo_pad), lambda b: (0, 0)),
                pl.BlockSpec((1, fo_pad), lambda b: (0, 0)),
            ],
            out_specs=pl.BlockSpec((bt, n_pad, fo_pad), lambda b: (b, 0, 0)),
        ),
        compiler_params=pltpu.CompilerParams(
            dimension_semantics=("parallel",),
            vmem_limit_bytes=vmem_limit,
        ),
    )(A, x, w_t, b2d)

    # TODO(synk): for very large N or F on v7x (64 MiB VMEM), add a second grid
    # axis tiling the query rows of A (and Fout of the weight) so a full (N,N)
    # block and the full (Fin,Fout) weight are never co-resident; unnecessary at
    # these sizes.
    return out[:B, :N, :Fout]


def make_gconv_params(key, in_features, out_features):
    """Deterministic weight_norm-parameterized Linear params (v, g, bias)."""
    kv, kg, kb = jax.random.split(key, 3)
    bound = 1.0 / jnp.sqrt(in_features)
    v = jax.random.uniform(kv, (out_features, in_features), jnp.float32,
                           -bound, bound)
    # PyTorch weight_norm init: g = ||v|| along dims != 0 (so W == v initially);
    # perturb g deterministically just to exercise the reparameterization.
    g = jnp.linalg.norm(v, axis=1, keepdims=True) * (
        1.0 + 0.1 * jax.random.uniform(kg, (out_features, 1), jnp.float32))
    bias = jax.random.uniform(kb, (out_features,), jnp.float32, -bound, bound)
    return v, g, bias


def effective_weight(v, g):
    # weight_norm (dim=0): W = g * v / ||v||_row
    return g * v / jnp.linalg.norm(v, axis=1, keepdims=True)


@jax.jit
def siamese_gconv(A1, x1, A2, x2, v, g, bias):
    w_eff = effective_weight(v, g)
    # Fuse both Siamese branches (shared weights) into one pallas_call.
    if A1.shape == A2.shape and x1.shape == x2.shape:
        A = jnp.concatenate([A1, A2], axis=0)
        x = jnp.concatenate([x1, x2], axis=0)
        out = gconv_pallas(A, x, w_eff, bias)
        B = A1.shape[0]
        return out[:B], out[B:]
    return (gconv_pallas(A1, x1, w_eff, bias),
            gconv_pallas(A2, x2, w_eff, bias))


def _reference(A, x, w_eff, bias):
    A = jax.nn.softmax(A, axis=-1)
    ux = jax.nn.relu(x @ w_eff.T + bias)
    return x + jnp.einsum("bij,bjf->bif", A, ux)


if __name__ == "__main__":
    B, N, F = 2, 8, 32          # in_features == num_features (residual add)
    key = jax.random.PRNGKey(0)
    k1, k2, k3, k4, kp = jax.random.split(key, 5)

    A1 = jax.random.normal(k1, (B, N, N), jnp.float32)
    x1 = jax.random.normal(k2, (B, N, F), jnp.float32)
    A2 = jax.random.normal(k3, (B, N, N), jnp.float32)
    x2 = jax.random.normal(k4, (B, N, F), jnp.float32)

    v, g, bias = make_gconv_params(kp, F, F)

    emb1, emb2 = siamese_gconv(A1, x1, A2, x2, v, g, bias)
    jax.block_until_ready((emb1, emb2))

    # Correctness check against a pure-JAX f32 reference (bf16 MXU operands in
    # the kernel -> bf16-level tolerance).
    w_eff = effective_weight(v, g)
    ref1 = _reference(A1, x1, w_eff, bias)
    ref2 = _reference(A2, x2, w_eff, bias)
    assert jnp.allclose(emb1, ref1, atol=3e-2, rtol=3e-2), \
        float(jnp.max(jnp.abs(emb1 - ref1)))
    assert jnp.allclose(emb2, ref2, atol=3e-2, rtol=3e-2), \
        float(jnp.max(jnp.abs(emb2 - ref2)))

    print("KERNEL_OK")
</pallas_src>

<mosaic_0001>
module attributes {stable_mosaic.version = 11 : i64} {
  func.func @_gconv_kernel(%arg0: i32, %arg1: memref<1x8x8xf32, #tpu.memory_space<vmem>>, %arg2: memref<1x8x128xf32, #tpu.memory_space<vmem>>, %arg3: memref<128x128xbf16, #tpu.memory_space<vmem>>, %arg4: memref<1x128xf32, #tpu.memory_space<vmem>>, %arg5: memref<1x8x128xf32, #tpu.memory_space<vmem>>) attributes {dimension_semantics = [#tpu.dimension_semantics<parallel>], iteration_bounds = array<i64: 4>, scalar_prefetch = 0 : i64, scratch_operands = 0 : i64, tpu.core_type = #tpu.core_type<tc>, window_params = [{transform_indices = @transform_0, window_bounds = array<i64: 1, 8, 8>}, {transform_indices = @transform_1, window_bounds = array<i64: 1, 8, 128>}, {pipeline_mode = #tpu.pipeline_mode<synchronous>, transform_indices = @transform_2, window_bounds = array<i64: 128, 128>}, {pipeline_mode = #tpu.pipeline_mode<synchronous>, transform_indices = @transform_3, window_bounds = array<i64: 1, 128>}, {transform_indices = @transform_4, window_bounds = array<i64: 1, 8, 128>}]} {
    %c0 = arith.constant 0 : index
    %c0_0 = arith.constant 0 : index
    %c0_1 = arith.constant 0 : index
    %0 = vector.load %arg1[%c0, %c0_0, %c0_1] : memref<1x8x8xf32, #tpu.memory_space<vmem>>, vector<1x8x8xf32>
    %cst = arith.constant dense<0xFF800000> : vector<1x8xf32>
    %1 = vector.multi_reduction <maximumf>, %0, %cst [2] : vector<1x8x8xf32> to vector<1x8xf32>
    %2 = vector.shape_cast %1 : vector<1x8xf32> to vector<1x8x1xf32>
    %3 = vector.broadcast %2 : vector<1x8x1xf32> to vector<1x8x8xf32>
    %4 = arith.subf %0, %3 : vector<1x8x8xf32>
    %5 = math.exp %4 : vector<1x8x8xf32>
    %cst_2 = arith.constant dense<0.000000e+00> : vector<1x8xf32>
    %6 = vector.multi_reduction <add>, %5, %cst_2 [2] : vector<1x8x8xf32> to vector<1x8xf32>
    %7 = vector.shape_cast %6 : vector<1x8xf32> to vector<1x8x1xf32>
    %8 = tpu.reciprocal %7 {approx = true} : vector<1x8x1xf32> -> vector<1x8x1xf32>
    %9 = vector.broadcast %8 : vector<1x8x1xf32> to vector<1x8x8xf32>
    %10 = arith.mulf %5, %9 : vector<1x8x8xf32>
    %11 = arith.truncf %10 : vector<1x8x8xf32> to vector<1x8x8xbf16>
    %c0_3 = arith.constant 0 : index
    %c0_4 = arith.constant 0 : index
    %c0_5 = arith.constant 0 : index
    %12 = vector.load %arg2[%c0_3, %c0_4, %c0_5] : memref<1x8x128xf32, #tpu.memory_space<vmem>>, vector<1x8x128xf32>
    %13 = vector.shape_cast %12 : vector<1x8x128xf32> to vector<8x128xf32>
    %14 = arith.truncf %13 : vector<8x128xf32> to vector<8x128xbf16>
    %c0_6 = arith.constant 0 : index
    %c0_7 = arith.constant 0 : index
    %15 = vector.load %arg3[%c0_6, %c0_7] : memref<128x128xbf16, #tpu.memory_space<vmem>>, vector<128x128xbf16>
    %cst_8 = arith.constant dense<0.000000e+00> : vector<8x128xf32>
    %16 = tpu.matmul %14, %15, %cst_8 {dimension_numbers = #tpu.dot_dimension_numbers<[1], [0], [0], [1], [0, 0, 1, 1], [], []>} : vector<8x128xbf16>, vector<128x128xbf16>, vector<8x128xf32> -> vector<8x128xf32>
    %c0_9 = arith.constant 0 : index
    %c0_10 = arith.constant 0 : index
    %17 = vector.load %arg4[%c0_9, %c0_10] : memref<1x128xf32, #tpu.memory_space<vmem>>, vector<1x128xf32>
    %18 = vector.broadcast %17 : vector<1x128xf32> to vector<8x128xf32>
    %19 = arith.addf %16, %18 : vector<8x128xf32>
    %cst_11 = arith.constant 0.000000e+00 : f32
    %20 = vector.broadcast %cst_11 : f32 to vector<8x128xf32>
    %21 = arith.maximumf %19, %20 : vector<8x128xf32>
    %22 = vector.shape_cast %21 : vector<8x128xf32> to vector<1x8x128xf32>
    %23 = arith.truncf %22 : vector<1x8x128xf32> to vector<1x8x128xbf16>
    "tpu.trace_start"() <{level = 10 : i32, message = "bij,bjf->bif"}> : () -> ()
    %cst_12 = arith.constant dense<0.000000e+00> : vector<1x8x128xf32>
    %24 = tpu.matmul %11, %23, %cst_12 {dimension_numbers = #tpu.dot_dimension_numbers<[2], [1], [1], [2], [0, 0, 0, 1, 1, 2], [0], [0]>} : vector<1x8x8xbf16>, vector<1x8x128xbf16>, vector<1x8x128xf32> -> vector<1x8x128xf32>
    "tpu.trace_stop"() : () -> ()
    %25 = arith.addf %12, %24 : vector<1x8x128xf32>
    %c0_13 = arith.constant 0 : index
    %c0_14 = arith.constant 0 : index
    %c0_15 = arith.constant 0 : index
    %26 = vector.load %arg5[%c0_13, %c0_14, %c0_15] : memref<1x8x128xf32, #tpu.memory_space<vmem>>, vector<1x8x128xf32>
    tpu.vector_store %arg5[%c0_13, %c0_14, %c0_15], %25 {strides = array<i32>} : memref<1x8x128xf32, #tpu.memory_space<vmem>>, vector<1x8x128xf32>,
    return
  }
  func.func @transform_0(%arg0: i32) -> (i32, i32, i32) {
    %c0_i32 = arith.constant 0 : i32
    %c0_i32_0 = arith.constant 0 : i32
    %c0_i32_1 = arith.constant 0 : i32
    return %arg0, %c0_i32, %c0_i32_0 : i32, i32, i32
  }
  func.func @transform_1(%arg0: i32) -> (i32, i32, i32) {
    %c0_i32 = arith.constant 0 : i32
    %c0_i32_0 = arith.constant 0 : i32
    %c0_i32_1 = arith.constant 0 : i32
    return %arg0, %c0_i32, %c0_i32_0 : i32, i32, i32
  }
  func.func @transform_2(%arg0: i32) -> (i32, i32) {
    %c0_i32 = arith.constant 0 : i32
    %c0_i32_0 = arith.constant 0 : i32
    %c0_i32_1 = arith.constant 0 : i32
    return %c0_i32, %c0_i32_0 : i32, i32
  }
  func.func @transform_3(%arg0: i32) -> (i32, i32) {
    %c0_i32 = arith.constant 0 : i32
    %c0_i32_0 = arith.constant 0 : i32
    %c0_i32_1 = arith.constant 0 : i32
    return %c0_i32, %c0_i32_0 : i32, i32
  }
  func.func @transform_4(%arg0: i32) -> (i32, i32, i32) {
    %c0_i32 = arith.constant 0 : i32
    %c0_i32_0 = arith.constant 0 : i32
    %c0_i32_1 = arith.constant 0 : i32
    return %arg0, %c0_i32, %c0_i32_0 : i32, i32, i32
  }
}

</mosaic_0001>

<bundles_post_ra>
// kernel: siamese_gconv.1
= control target key start
LH: loop header
LB: loop body
LE: loop exit
PB: predicated region body
PF: predicated region fallthrough
CT: control target
= control target key end

     0   :  { %s1237_s0 = inlined_call_operand.hbm [shape: f32[4,8,8], index: 0, kind: input, shape index: {}]   ;;  %s1238_s1 = inlined_call_operand.hbm [shape: f32[4,8,128], index: 1, kind: input, shape index: {}]   ;;  %s1239_s2 = inlined_call_operand.hbm [shape: bf16[128,128], index: 2, kind: input, shape index: {}]   ;;  %s1240_s3 = inlined_call_operand.hbm [shape: f32[1,128], index: 3, kind: input, shape index: {}]   ;;  %s1241_s4 = inlined_call_operand.hbm [shape: f32[4,8,128], index: 4, kind: output, shape index: {}]  }
   0x1   :  { %1246 = sst [smem:[#allocation16_spill]] %s1239_s2 }
   0x2   :  { %9 = vsyncpa [#allocation3], 0 }
   0x3   :  { %11 = vsyncpa [#allocation3 + $0x1], 0 }
   0x4   :  { %12 = vsyncpa [#allocation6], 0 }
   0x5   :  { %14 = vsyncpa [#allocation6 + $0x1], 0 }
   0x6   :  { %15 = vsyncpa [#allocation9], 0 }
   0x7   :  { %16 = vsyncpa [#allocation4], 0 }
   0x8   :  { %18 = vsyncpa [#allocation4 + $0x1], 0  ;;  %s966_s15 = smov 0   ;;  %s968_s16 = smov 0  }
   0x9   :  { %s970_s17 = smov 0   ;;  %s972_s18 = smov 0  }
   0xa LB: > { %s987_s19 = sadd.s32 4294967295, %s930_s18   ;;  %s582_s20 = sadd.s32 4294967294, %s930_s18   ;;  %s930_s18 = sphi %s972_s18, %s1266_s18   ;;  %s926_s17 = sphi %s970_s17, %s1265_s17   ;;  %s922_s16 = sphi %s968_s16, %s1264_s16   ;;  %s918_s15 = sphi %s966_s15, %s1263_s15  }
   0xb   : > { %p44_p0 = scmp.ne.s32.totalorder %s922_s16, %s918_s15  ;;  %p1242_p1 = scmp.eq.s32.totalorder %s987_s19, 0 }
   0xc   : > { %p142_p3 = scmp.eq.s32.totalorder %s582_s20, 3  ;;  %p583_p5 = scmp.ge.s32.totalorder %s930_s18, 1 }
   0xd   : > { %p996_p4 = por %p1242_p1, %p44_p0  ;;  %p149_p7 = scmp.lt.s32.totalorder %s930_s18, 5 }
   0xe   : > { %p1001_p6 = por %p142_p3, %p44_p0  ;;  %s932_s24 = smov [#allocation7]  }
   0xf   : > { %s1247_s21 = scalar_select %p996_p4, 1, 0 }
  0x10   : > { %s1248_s22 = scalar_select %p1001_p6, 1, 0 }
  0x11   : > { %p1006_p8 = pnand %p583_p5, %p149_p7  ;;  %s161_s25 = sshll.u32 %s932_s24, 4  ;;  %s162_s25 = int_to_ptr.vmem [resolvable:$true] %s161_s25 }
  0x12   : > { %s933_s27 = smov [#allocation8]   ;;  %s1251_s2 = sld [smem:[#allocation16_spill]] }
  0x13   : > { %s1249_s23 = scalar_select %p1006_p8, 1, 0 }
  0x14   : > { %p662_p9 = pneg %p1006_p8  ;;  %s175_s28 = sshll.u32 %s933_s27, 4  ;;  %s1018_s28 = int_to_ptr.vmem [resolvable:$true] %s175_s28 }
  0x16   : > { %p1014_p10 = pnand %p662_p9, %p1242_p1 }
  0x18   : > { %s736_s5 = scalar_lea.hbm %s1251_s2, 1024  ;;  %p738_p12 = pneg %p1014_p10 }
  0x19   : > { %p737_p11 = scmp.ne.s32.totalorder %s1251_s2, %s736_s5  ;;  %p743_p3 = scmp.lt.u32.totalorder %s736_s5, %s1251_s2 }
  0x1b   : > { %p739_p13 = pnand %p738_p12, %p737_p11 }
  0x1d   : > { %p740_p0 = pneg %p739_p13 }
  0x1f   : > { %p745_p5 = pnand %p743_p3, %p740_p0 }
  0x21   : > { %748 = shalt.err (!%p745_p5)
}
  0x22   : > { %s749_s10 = scalar_lea.vmem %s162_s25, 1024  ;;  %p757_p2 = scmp.lt.s32.totalorder %s162_s25, %s162_s25 }
  0x23   : > { %p750_p7 = scmp.ne.s32.totalorder %s162_s25, %s749_s10  ;;  %p758_p6 = scmp.lt.s32.totalorder %s749_s10, %s749_s10 }
  0x25   : > { %p752_p9 = pnand %p750_p7, %p738_p12  ;;  %p759_p4 = por %p758_p6, %p757_p2 }
  0x27   : > { %p753_p1 = pneg %p752_p9 }
  0x29   : > { %p760_p8 = pnand %p759_p4, %p753_p1 }
  0x2b   : > { %763 = shalt.err (!%p760_p8)
}
  0x2c   : > { %s934_s11 = smov 64   ;;  %s935_s12 = smov 4  }
  0x2d   : > { %665 = dma.hbm_to_vmem [thread:$0]  (!%p1014_p10), %s1251_s2, 1024, %s162_s25, [#allocation6], %s934_s11, %s934_s11, %s935_s12  }
  0x2e   : > { %s764_s27 = scalar_lea.hbm %s1240_s3, 16 }
  0x2f   : > { %p765_p11 = scmp.ne.s32.totalorder %s1240_s3, %s764_s27  ;;  %p771_p4 = scmp.lt.u32.totalorder %s764_s27, %s1240_s3 }
  0x31   : > { %p767_p1 = pnand %p765_p11, %p738_p12 }
  0x33   : > { %p768_p2 = pneg %p767_p1 }
  0x35   : > { %p773_p6 = pnand %p771_p4, %p768_p2 }
  0x37   : > { %776 = shalt.err (!%p773_p6)
}
  0x38   : > { %s777_s25 = scalar_lea.vmem %s1018_s28, 16  ;;  %s784_s7 = scalar_lea.vmem %s1018_s28, 32 }
  0x39   : > { %p778_p8 = scmp.ne.s32.totalorder %s1018_s28, %s777_s25  ;;  %p785_p3 = scmp.lt.s32.totalorder %s1018_s28, %s1018_s28 }
  0x3a   : > { %p786_p5 = scmp.lt.s32.totalorder %s784_s7, %s777_s25 }
  0x3b   : > { %p780_p13 = pnand %p778_p8, %p738_p12 }
  0x3c   : > { %p787_p7 = por %p786_p5, %p785_p3 }
  0x3d   : > { %p781_p0 = pneg %p780_p13 }
  0x3f   : > { %p788_p9 = pnand %p787_p7, %p781_p0 }
  0x41   : > { %791 = shalt.err (!%p788_p9)
}
  0x42   : > { %668 = dma.hbm_to_vmem [thread:$0]  (!%p1014_p10), %s1240_s3, 16, %s1018_s28, [#allocation9]  }
  0x43   : > { %s1069_s10 = sadd.s32 1, %s930_s18   ;;  %s31_s26 = sadd.s32 1, %s926_s17 }
  0x44   : > { %s28_s11 = ssub.s32 %s930_s18, %s1069_s10  ;;  %p38_p12 = scmp.ne.s32.totalorder %s926_s17, %s922_s16 }
  0x45   : > { %p29_p11 = scmp.eq.s32.totalorder %s28_s11, 0  ;;  %p39_p1 = scmp.eq.s32.totalorder %s930_s18, 0 }
  0x46   : > { %p1252_p2 = scmp.eq.s32.totalorder %s987_s19, 3  ;;  %p682_p6 = scmp.lt.s32.totalorder %s930_s18, 4 }
  0x47   : > { %s1085_s13 = scalar_select %p29_p11, %s926_s17, %s31_s26  }
  0x48   : > { %p1079_p4 = por %p1252_p2, %p38_p12  ;;  %p40_p8 = por %p39_p1, %p38_p12 }
  0x49   : > { %s186_s14 = sand.u32 1, %s926_s17   ;;  %s588_s20 = sshll.u32 %s930_s18, 7 }
  0x4a   : > { %s1253_s12 = scalar_select %p1079_p4, 1, 0 }
  0x4b   : > { %s1088_s28 = sshll.u32 %s186_s14, 3  ;;  %s1094_s29 = scalar_lea.hbm %s1237_s0, %s588_s20 }
  0x4c   : > { %s190_s30 = scalar_lea.vmem [#allocation2], %s1088_s28  ;;  %p1099_p10 = pnand %p682_p6, %p40_p8 }
  0x4d   : > { %s197_s5 = sshll.u32 %s190_s30, 4  ;;  %s1106_s8 = scalar_lea.hbm %s1238_s1, %s588_s20  ;;  %s1097_s5 = int_to_ptr.vmem [resolvable:$true] %s197_s5 }
  0x4e   : > { %s204_s9 = sand.u32 1, %s930_s18   ;;  %s187_s26 = scalar_lea.sflag [#allocation3], %s186_s14 }
  0x4f   : > { %s792_s11 = scalar_lea.hbm %s1094_s29, 128  ;;  %p794_p0 = pneg %p1099_p10 }
  0x50   : > { %p793_p13 = scmp.ne.s32.totalorder %s1094_s29, %s792_s11  ;;  %s797_s30 = scalar_lea.hbm %s1237_s0, 512 }
  0x51   : > { %p798_p7 = scmp.lt.u32.totalorder %s1094_s29, %s1237_s0  ;;  %p799_p9 = scmp.lt.u32.totalorder %s797_s30, %s792_s11 }
  0x52   : > { %p795_p3 = pnand %p794_p0, %p793_p13  ;;  %p801_p11 = scmp.lt.u32.totalorder %s792_s11, %s1094_s29 }
  0x53   : > { %p800_p12 = por %p799_p9, %p798_p7 }
  0x54   : > { %p796_p5 = pneg %p795_p3 }
  0x55   : > { %p802_p1 = por %p801_p11, %p800_p12 }
  0x57   : > { %p803_p2 = pnand %p802_p1, %p796_p5 }
  0x59   : > { %806 = shalt.err (!%p803_p2)
}
  0x5a   : > { %s807_s14 = scalar_lea.vmem %s1097_s5, 128  ;;  %s936_s20 = smov [#allocation2]  }
  0x5b   : > { %p808_p6 = scmp.ne.s32.totalorder %s1097_s5, %s807_s14  ;;  %s812_s7 = sshll.u32 %s936_s20, 4  ;;  %s813_s7 = int_to_ptr.vmem [resolvable:$false] %s812_s7 }
  0x5c   : > { %s814_s2 = scalar_lea.vmem %s813_s7, 256  ;;  %p815_p3 = scmp.lt.s32.totalorder %s1097_s5, %s813_s7 }
  0x5d   : > { %p810_p8 = pnand %p808_p6, %p794_p0  ;;  %p816_p7 = scmp.lt.s32.totalorder %s814_s2, %s807_s14 }
  0x5f   : > { %p811_p13 = pneg %p810_p8  ;;  %p817_p9 = por %p816_p7, %p815_p3 }
  0x61   : > { %p818_p12 = pnand %p817_p9, %p811_p13 }
  0x63   : > { %821 = shalt.err (!%p818_p12)
}
  0x64   : > { %672 = dma.hbm_to_vmem [thread:$0]  (!%p1099_p10), %s1094_s29, 128, %s1097_s5, %s187_s26  }
  0x65   : > { %s208_s11 = scalar_lea.vmem [#allocation5], %s1088_s28  ;;  %s205_s27 = scalar_lea.sflag [#allocation6], %s204_s9 }
  0x66   : > { %s215_s24 = sshll.u32 %s208_s11, 4  ;;  %s822_s30 = scalar_lea.hbm %s1106_s8, 128  ;;  %s216_s24 = int_to_ptr.vmem [resolvable:$true] %s215_s24 }
  0x67   : > { %p823_p5 = scmp.ne.s32.totalorder %s1106_s8, %s822_s30  ;;  %s827_s20 = scalar_lea.hbm %s1238_s1, 512 }
  0x68   : > { %p828_p2 = scmp.lt.u32.totalorder %s1106_s8, %s1238_s1  ;;  %p829_p6 = scmp.lt.u32.totalorder %s827_s20, %s822_s30 }
  0x69   : > { %p825_p11 = pnand %p823_p5, %p794_p0  ;;  %p831_p13 = scmp.lt.u32.totalorder %s822_s30, %s1106_s8 }
  0x6a   : > { %p830_p8 = por %p829_p6, %p828_p2 }
  0x6b   : > { %p826_p1 = pneg %p825_p11 }
  0x6c   : > { %p832_p3 = por %p831_p13, %p830_p8 }
  0x6e   : > { %p833_p7 = pnand %p832_p3, %p826_p1 }
  0x70   : > { %836 = shalt.err (!%p833_p7)
}
  0x71   : > { %s837_s28 = scalar_lea.vmem %s216_s24, 128  ;;  %s937_s29 = smov [#allocation5]  }
  0x72   : > { %p838_p9 = scmp.ne.s32.totalorder %s216_s24, %s837_s28  ;;  %s842_s5 = sshll.u32 %s937_s29, 4  ;;  %s843_s5 = int_to_ptr.vmem [resolvable:$false] %s842_s5 }
  0x73   : > { %s844_s9 = scalar_lea.vmem %s843_s5, 256  ;;  %p845_p11 = scmp.lt.s32.totalorder %s216_s24, %s843_s5 }
  0x74   : > { %p840_p12 = pnand %p838_p9, %p794_p0  ;;  %p846_p4 = scmp.lt.s32.totalorder %s844_s9, %s837_s28 }
  0x76   : > { %p841_p5 = pneg %p840_p12  ;;  %p847_p2 = por %p846_p4, %p845_p11 }
  0x78   : > { %p848_p6 = pnand %p847_p2, %p841_p5 }
  0x7a   : > { %851 = shalt.err (!%p848_p6)
}
  0x7b   : > { %675 = dma.hbm_to_vmem [thread:$0]  (!%p1099_p10), %s1106_s8, 128, %s216_s24, %s205_s27  }
  0x7c   : > { %p1255_p1 = scmp.ne.s32.totalorder %s1249_s23, 0 }
  0x7d   : > { %s1159_s26 = sand.u32 (!%p1255_p1), 1, %s922_s16   ;;  %p1256_p4 = scmp.ne.s32.totalorder (!%p1255_p1), %s1247_s21, 0 }
  0x7e   : > { %224 = sbr.rel (%p1255_p1) target bundleno = 690 (0x2b2), region = 36  ;;  %s1162_s11 = sshll.u32 (!%p1255_p1), %s1159_s26, 3 }
  0x7f   : > { %s227_s30 = scalar_lea.sflag (!%p1255_p1), [#allocation3], %s1159_s26  ;;  %s230_s25 = scalar_lea.vmem (!%p1255_p1), [#allocation2], %s1162_s11 }
  0x85   : > { %897 = dma.done.wait (%p1256_p4), %s227_s30, 128  }
  0x86   : > { %899 = vsyncadd (%p1256_p4), %s227_s30, 4294967168  ;;  %s235_s23 = sand.u32 1, %s987_s19   ;;  %s239_s8 = scalar_lea.vmem [#allocation5], %s1162_s11 }
  0x87   : > { %s236_s6 = scalar_lea.sflag [#allocation6], %s235_s23 }
  0x88   : > { %901 = dma.done.wait (%p1256_p4), %s236_s6, 128  }
  0x89   : > { %903 = vsyncadd (%p1256_p4), %s236_s6, 4294967168  ;;  %p1257_p10 = scmp.eq.s32.totalorder %s987_s19, 0 }
  0x8b   : > { %905 = dma.done.wait (%p1257_p10), [#allocation6], 1024   ;;  %p1258_p0 = pmov %p1257_p10 }
  0x8d   : > { %907 = vsyncadd (%p1258_p0), [#allocation6], 4294966272  ;;  %p1259_p8 = pmov %p1258_p0 }
  0x8e   : > { %p1260_p13 = pmov %p1258_p0 }
  0x8f   : > { %909 = dma.done.wait (%p1259_p8), [#allocation9], 16  }
  0x90   : > { %911 = vsyncadd (%p1260_p13), [#allocation9], 4294967280  ;;  %v938_v0 = vmov 0.0   ;;  %vm939_vm0 = vmmov 0   ;;  %vm279_vm1 = vcmask 64512   ;;  %v278_v1 = vld [vmem:[%s230_s25] sm:$0xff] }
  0x91   : > { %622 = vmatprep.subr.bf16.mxu0 %v938_v0  ;;  %638 = vmatprep.mubr.msk.bf16.mxu0 %vm939_vm0, %v938_v0  ;;  %v280_v2 = vsel %vm279_vm1, %v278_v1, -inf  ;;  %v724_v3 = vld [vmem:[#allocation7] sm:$0xff]   ;;  %v725_v4 = vld [vmem:[#allocation7 + $0x8] sm:$0xff]   ;;  %v726_v5 = vld [vmem:[#allocation7 + $0x10] sm:$0xff]   ;;  %vm410_vm2 = vcmask 1043456   ;;  %s608_s21 = sshll.u32 %s987_s19, 7 }
  0x92   : > { %642 = vmatprep.subr.bf16.mxu1 %v938_v0  ;;  %644 = vmatprep.mubr.msk.bf16.mxu1 %vm939_vm0, %v938_v0  ;;  %v727_v6 = vld [vmem:[#allocation7 + $0x18] sm:$0xff]   ;;  %v728_v7 = vld [vmem:[#allocation7 + $0x20] sm:$0xff]   ;;  %v729_v8 = vld [vmem:[#allocation7 + $0x28] sm:$0xff]   ;;  %s276_s24 = scalar_lea.vmem [#allocation10], %s1162_s11  ;;  %s1194_s7 = scalar_lea.hbm %s1241_s4, %s608_s21 }
  0x93   : > { %281 = vmax.xlane.f32.xlu0 %v280_v2  ;;  %623 = vmatpush3.bf16.msra.mxu0 %v724_v3  ;;  %v730_v9 = vld [vmem:[#allocation7 + $0x30] sm:$0xff]   ;;  %v731_v10 = vld [vmem:[#allocation7 + $0x38] sm:$0xff]   ;;  %v597_v18 = vld [vmem:[#allocation8] ss:$0 sm:$0xff]  ;;  %s470_s27 = sshll.u32 %s276_s24, 4  ;;  %s457_s2 = scalar_lea.sflag [#allocation4], %s1159_s26  ;;  %s1196_s27 = int_to_ptr.vmem [resolvable:$true] %s470_s27 }
  0x94   : > { %624 = vmatprep.subr.bf16.mxu0 %v938_v0  ;;  %v292_v11 = vld [vmem:[%s239_s8] sm:$0xff]  ;;  %s852_s19 = scalar_lea.vmem %s1196_s27, 128  ;;  %p1261_p7 = scmp.ne.s32.totalorder %s1253_s12, 0 }
  0x95   : > { %v293_v12 = vpack.c.bf16 %v292_v11, %v292_v11  ;;  %p853_p3 = scmp.ne.s32.totalorder %s1196_s27, %s852_s19  ;;  %s940_s28 = smov [#allocation10]  }
  0x96   : > { %s856_s29 = sshll.u32 %s940_s28, 4  ;;  %s857_s29 = int_to_ptr.vmem [resolvable:$false] %s856_s29 }
  0x97   : > { %625 = vmatpush3.bf16.msra.mxu0 %v725_v4  ;;  %p854_p9 = pnand %p853_p3, %p1261_p7  ;;  %s858_s5 = scalar_lea.vmem %s857_s29, 256 }
  0x98   : > { %626 = vmatprep.subr.bf16.mxu0 %v938_v0  ;;  %p859_p5 = scmp.lt.s32.totalorder %s1196_s27, %s857_s29  ;;  %p860_p11 = scmp.lt.s32.totalorder %s858_s5, %s852_s19 }
  0x99   : > { %p855_p12 = pneg %p854_p9 }
  0x9a   : > { %p861_p2 = por %p860_p11, %p859_p5 }
  0x9b   : > { %627 = vmatpush3.bf16.msra.mxu0 %v726_v5 }
  0x9c   : > { %628 = vmatprep.subr.bf16.mxu0 %v938_v0  ;;  %p862_p6 = pnand %p861_p2, %p855_p12 }
  0x9f   : > { %629 = vmatpush3.bf16.msra.mxu0 %v727_v6 }
  0xa0   : > { %630 = vmatprep.subr.bf16.mxu0 %v938_v0 }
  0xa3   : > { %631 = vmatpush3.bf16.msra.mxu0 %v728_v7 }
  0xa4   : > { %632 = vmatprep.subr.bf16.mxu0 %v938_v0 }
  0xa7   : > { %633 = vmatpush3.bf16.msra.mxu0 %v729_v8 }
  0xa8   : > { %634 = vmatprep.subr.bf16.mxu0 %v938_v0 }
  0xab   : > { %635 = vmatpush3.bf16.msra.mxu0 %v730_v9 }
  0xac   : > { %636 = vmatprep.subr.bf16.mxu0 %v938_v0 }
  0xaf   : > { %637 = vmatpush3.bf16.msra.mxu0 %v731_v10 }
  0xb2   : > { %639 = vmatmul.mubr.bf16.vlgmr.msra.gmra.mrb[0].mxu0 %v293_v12 }
 0x120   : > { %v282_v13 = vpop.xlane.xlu0 %281 }
 0x121   : > { %v283_v14 = vsub.f32 %v278_v1, %v282_v13 }
 0x123   : > { %v284_v15 = vmul.f32 1.442695, %v283_v14 }
 0x125   : > { %732 = vpow2.f32 %v284_v15 }
 0x12f   : > { %v733_v16 = vpop.eup %732 }
 0x130   : > { %v286_v17 = vsel %vm279_vm1, %v733_v16, 0.0 }
 0x131   : > { %287 = vadd.xlane.f32.xlu0 %v286_v17 }
 0x185   : > { %v399_v19 = vpop.f32.mrb[0].mxu0 }
 0x186   : > { %v400_v20 = vadd.f32 %v597_v18, %v399_v19  ;;  %v640_v21 = vpop.f32.mrb[1].mxu0 }
 0x187   : > { %v402_v22 = vpop.f32.mrb[2].mxu0 }
 0x188   : > { %v405_v23 = vmax.f32 %v400_v20, 0.0  ;;  %v641_v24 = vpop.f32.mrb[3].mxu0 }
 0x18a   : > { %v406_v25 = vpack.c.bf16 %v405_v23, %v405_v23 }
 0x18c   : > { %v412_v26 = vsel %vm410_vm2, %v406_v25, 0 }
 0x18d   : > { %643 = vmatpush3.bf16.msra.mxu1 %v412_v26 }
 0x1be   : > { %v288_v27 = vpop.xlane.xlu0 %287 }
 0x1bf   : > { %734 = vrcp.f32 %v288_v27 }
 0x1c9   : > { %v735_v28 = vpop.eup %734 }
 0x1ca   : > { %v290_v29 = vmul.f32 %v735_v28, %v733_v16 }
 0x1cc   : > { %v291_v30 = vpack.c.bf16 %v290_v29, %v290_v29 }
 0x1ce   : > { %645 = vmatmul.mubr.msk.bf16.vlgmr.msra.gmra.mrb[0].mxu1 %vm279_vm1, %v291_v30 }
 0x2a1   : > { %v448_v31 = vpop.f32.mrb[0].mxu1 }
 0x2a2   : > { %v454_v32 = vadd.f32 %v448_v31, %v292_v11  ;;  %v646_v33 = vpop.f32.mrb[1].mxu1 }
 0x2a3   : > { %v451_v34 = vpop.f32.mrb[2].mxu1 }
 0x2a4   : > { %455 = vst [vmem:[%s276_s24] sm:$0xff] %v454_v32  ;;  %v647_v35 = vpop.f32.mrb[3].mxu1 }
 0x2a5   : > { %865 = shalt.err (!%p862_p6)
}
 0x2a6   : > { %s866_s9 = scalar_lea.hbm %s1194_s7, 128  ;;  %s870_s30 = scalar_lea.hbm %s1241_s4, 512 }
 0x2a7   : > { %p867_p1 = scmp.ne.s32.totalorder %s1194_s7, %s866_s9  ;;  %p871_p0 = scmp.lt.u32.totalorder %s1194_s7, %s1241_s4 }
 0x2a8   : > { %p872_p8 = scmp.lt.u32.totalorder %s870_s30, %s866_s9  ;;  %p874_p3 = scmp.lt.u32.totalorder %s866_s9, %s1194_s7 }
 0x2a9   : > { %p868_p4 = pnand %p867_p1, %p1261_p7 }
 0x2aa   : > { %p873_p13 = por %p872_p8, %p871_p0 }
 0x2ab   : > { %p869_p10 = pneg %p868_p4 }
 0x2ac   : > { %p875_p9 = por %p874_p3, %p873_p13 }
 0x2ae   : > { %p876_p12 = pnand %p875_p9, %p869_p10 }
 0x2b0   : > { %879 = shalt.err (!%p876_p12)
}
 0x2b1   : > { %660 = dma.vmem_to_hbm [thread:$0]  (%p1261_p7), %s1196_s27, 128, %s1194_s7, %s457_s2  }
 0x2b2 PF: > { %p685_p5 = scmp.ge.s32.totalorder %s930_s18, 2  ;;  %s482_s6 = sand.u32 1, %s918_s15  }
 0x2b3   : > { %p1262_p11 = scmp.ne.s32.totalorder %s1248_s22, 0  ;;  %s483_s8 = scalar_lea.sflag [#allocation4], %s482_s6 }
 0x2b5   : > { %p677_p2 = pnand %p685_p5, %p1262_p11 }
 0x2b7   : > { %913 = dma.done.wait (!%p677_p2), %s483_s8, 128  }
 0x2b8   : > { %915 = vsyncadd (!%p677_p2), %s483_s8, 4294967168  ;;  %p21_p6 = scmp.ge.s32.totalorder %s1069_s10, 6   ;;  %s1263_s15 = smov %s922_s16 }
 0x2b9   : > { %s1264_s16 = smov %s926_s17  ;;  %s1265_s17 = smov %s1085_s13 }
 0x2ba   : > { %s1266_s18 = smov %s1069_s10  ;;  %23 = sbr.rel (!%p21_p6) target bundleno = 10 (0xa), region = 102 }
 0x2c1   :  { %488 = vsyncpa [#allocation3], 1 }
 0x2c2   :  { %490 = vsyncpa [#allocation3 + $0x1], 1 }
 0x2c3   :  { %491 = vsyncpa [#allocation6], 1 }
 0x2c4   :  { %493 = vsyncpa [#allocation6 + $0x1], 1 }
 0x2c5   :  { %494 = vsyncpa [#allocation9], 1 }
 0x2c6   :  { %495 = vsyncpa [#allocation4], 1 }
 0x2c7   :  { %497 = vsyncpa [#allocation4 + $0x1], 1 }

</bundles_post_ra>
